<compile_context>
chip_gen: v7x
topology: tpu7x:2x2x1
jax: 0.10.0
libtpu: 0.0.40
codegen_flags: <defaults>
</compile_context>

<pallas_src>
import functools

import jax
import jax.numpy as jnp
from jax.experimental import pallas as pl
from jax.experimental.pallas import tpu as pltpu


def _round_up(n, m):
    return ((n + m - 1) // m) * m


def _encoder_kernel(num_hidden, latent_pad, has_dropout, *refs):
    # ref order:
    #   x [batch, D], w_stack [Lh, D, D], gb_stack [Lh, 2, D],
    #   (mask_stack [Lh, batch, D] if dropout),
    #   w_head [D, 2*Lp], b_head [1, 2*Lp], eps [batch, Lp],
    #   out [batch, 3*Lp]  (= [mu_pad | logvar_pad | z_pad])
    i = 0
    x_ref = refs[i]; i += 1
    w_ref = refs[i]; i += 1
    gb_ref = refs[i]; i += 1
    mask_ref = None
    if has_dropout:
        mask_ref = refs[i]; i += 1
    w_head_ref = refs[i]; i += 1
    b_head_ref = refs[i]; i += 1
    eps_ref = refs[i]; i += 1
    out_ref = refs[i]

    h = x_ref[...].astype(jnp.float32)
    inv_batch = jnp.float32(1.0 / h.shape[0])

    for l in range(num_hidden):
        w = w_ref[l]                                   # [D, D]
        # Linear (bias omitted: exactly cancelled by BN mean subtraction, train mode).
        h = jnp.dot(h.astype(w.dtype), w, preferred_element_type=jnp.float32)
        # BatchNorm1d training mode: single-pass biased batch stats, eps = 1e-5,
        # fused affine (2 VPU ops on the [batch, D] tile).
        mean = jnp.sum(h, axis=0, keepdims=True) * inv_batch
        var = jnp.sum(h * h, axis=0, keepdims=True) * inv_batch - mean * mean
        gb = gb_ref[l]                                 # [2, D]: gamma row 0, beta row 1
        scale = gb[0:1, :] * jax.lax.rsqrt(var + 1e-5)
        shift = gb[1:2, :] - mean * scale
        h = h * scale + shift
        # LeakyReLU(0.2)
        h = jnp.where(h > 0, h, 0.2 * h)
        # Dropout: precomputed inverted-dropout mask in {0, 1/keep_p}.
        if has_dropout:
            h = h * mask_ref[l]

    # Fused mu/logvar head: one MXU op of lane-aligned width 2*latent_pad.
    w_head = w_head_ref[...]
    head = jnp.dot(h.astype(w_head.dtype), w_head,
                   preferred_element_type=jnp.float32) + b_head_ref[...]
    Lp = latent_pad
    mu = head[:, :Lp]
    logvar = head[:, Lp:]
    z = mu + jnp.exp(0.5 * logvar) * eps_ref[...]
    # Single full-width, lane-dense store.
    out_ref[...] = jnp.concatenate([head, z], axis=1)


def prepare_encoder_params(hidden_params, head_params, input_dim, *,
                           matmul_dtype=jnp.float32, lane=128):
    """One-time packing / zero-padding / casting of the Encoder parameters.

    hidden_params: list of (w [in, out], gamma [out], beta [out]); the Linear bias is
                   intentionally not taken (BatchNorm mean subtraction cancels it).
    head_params:   (w_mu [hid, L], b_mu [L], w_lv [hid, L], b_lv [L])
    Returns (packed_params, meta).
    """
    w_mu, b_mu, w_lv, b_lv = head_params
    latent = w_mu.shape[1]
    latent_pad = _round_up(latent, lane)

    dims = [input_dim] + [w.shape[1] for (w, _, _) in hidden_params]
    D = _round_up(max(dims), lane)   # common padded feature width (all layers stacked)

    w_list, gb_list = [], []
    prev = input_dim
    for (w, gamma, beta) in hidden_params:
        fi, fo = w.shape
        assert fi == prev, "hidden layer shapes must chain"
        w_list.append(jnp.pad(w.astype(jnp.float32), ((0, D - fi), (0, D - fo))))
        gb_list.append(jnp.pad(jnp.stack([gamma, beta]).astype(jnp.float32),
                               ((0, 0), (0, D - fo))))
        prev = fo
    w_stack = jnp.stack(w_list).astype(matmul_dtype)     # [Lh, D, D]
    gb_stack = jnp.stack(gb_list)                        # [Lh, 2, D] f32

    # Lane-dense fused head: each of mu/logvar padded to latent_pad lanes, then concat.
    w_head = jnp.concatenate(
        [jnp.pad(w_mu.astype(jnp.float32), ((0, D - prev), (0, latent_pad - latent))),
         jnp.pad(w_lv.astype(jnp.float32), ((0, D - prev), (0, latent_pad - latent)))],
        axis=1).astype(matmul_dtype)                     # [D, 2*latent_pad]
    b_head = jnp.concatenate(
        [jnp.pad(b_mu.astype(jnp.float32), (0, latent_pad - latent)),
         jnp.pad(b_lv.astype(jnp.float32), (0, latent_pad - latent))])[None, :]

    meta = dict(input_dim=input_dim, feat_pad=D, latent=latent, latent_pad=latent_pad,
                num_hidden=len(hidden_params),
                hidden_dims=tuple(w.shape[1] for (w, _, _) in hidden_params))
    return (w_stack, gb_stack, w_head, b_head), meta


def make_dropout_masks(key, meta, batch, drop_p=0.2):
    """Stacked inverted-dropout masks [num_hidden, batch, feat_pad] with {0, 1/keep_p}."""
    keep_p = 1.0 - drop_p
    keep = jax.random.bernoulli(key, keep_p, (meta["num_hidden"], batch, meta["feat_pad"]))
    return keep.astype(jnp.float32) * jnp.float32(1.0 / keep_p)


def encoder_forward(x, packed_params, meta, eps, dropout_masks=None, *,
                    vmem_limit_bytes=None):
    """Forward pass of the VAE Encoder. Returns (mu, logvar, z), each [batch, L] f32."""
    w_stack, gb_stack, w_head, b_head = packed_params
    batch, input_dim = x.shape
    assert input_dim == meta["input_dim"]
    D = meta["feat_pad"]
    latent = meta["latent"]
    Lp = meta["latent_pad"]

    # Zero-padded feature columns stay exactly 0 through Linear/BN/LeakyReLU/Dropout.
    x_p = jnp.pad(x.astype(jnp.float32), ((0, 0), (0, D - input_dim)))
    eps_p = jnp.pad(eps.astype(jnp.float32), ((0, 0), (0, Lp - latent)))

    inputs = [x_p, w_stack, gb_stack]
    if dropout_masks is not None:
        inputs.append(dropout_masks.astype(jnp.float32))
    inputs += [w_head, b_head, eps_p]

    kernel = functools.partial(_encoder_kernel, meta["num_hidden"], Lp,
                               dropout_masks is not None)
    extra = {}
    if vmem_limit_bytes is not None:
        extra["compiler_params"] = pltpu.CompilerParams(vmem_limit_bytes=vmem_limit_bytes)

    packed = pl.pallas_call(
        kernel,
        out_shape=jax.ShapeDtypeStruct((batch, 3 * Lp), jnp.float32),
        in_specs=[pl.BlockSpec(memory_space=pltpu.MemorySpace.VMEM) for _ in inputs],
        out_specs=pl.BlockSpec(memory_space=pltpu.MemorySpace.VMEM),
        **extra,
    )(*inputs)

    mu = packed[:, :latent]
    logvar = packed[:, Lp:Lp + latent]
    z = packed[:, 2 * Lp:2 * Lp + latent]
    return mu, logvar, z


def _reference(x, hidden_full, head_params, eps, dropout_masks=None):
    """Pure-JAX PyTorch training-mode forward (optionally with the same dropout mask)."""
    h = x
    for l, (w, b, g, beta) in enumerate(hidden_full):
        h = h @ w + b
        mean = jnp.mean(h, axis=0, keepdims=True)
        var = jnp.mean((h - mean) ** 2, axis=0, keepdims=True)
        h = (h - mean) / jnp.sqrt(var + 1e-5) * g + beta
        h = jnp.where(h > 0, h, 0.2 * h)
        if dropout_masks is not None:
            h = h * dropout_masks[l, :, :h.shape[1]]
    w_mu, b_mu, w_lv, b_lv = head_params
    mu = h @ w_mu + b_mu
    logvar = h @ w_lv + b_lv
    z = mu + jnp.exp(0.5 * logvar) * eps
    return mu, logvar, z


if __name__ == "__main__":
    batch = 8
    input_dim = 16
    hidden_dims = (32, 32)
    latent_dim = 8

    key = jax.random.PRNGKey(0)

    def linear_init(key, fan_in, fan_out):
        k_w, k_b = jax.random.split(key)
        bound = 1.0 / jnp.sqrt(fan_in)
        w = jax.random.uniform(k_w, (fan_in, fan_out), jnp.float32, -bound, bound)
        b = jax.random.uniform(k_b, (fan_out,), jnp.float32, -bound, bound)
        return w, b

    hidden_full = []     # (w, b, gamma, beta) for the reference (PyTorch layout)
    hidden_params = []   # (w, gamma, beta) for the kernel (bias folded away by BN)
    prev = input_dim
    for h_dim in hidden_dims:
        key, sub = jax.random.split(key)
        w, b = linear_init(sub, prev, h_dim)
        gamma = jnp.ones((h_dim,), jnp.float32)   # BatchNorm1d weight init
        beta = jnp.zeros((h_dim,), jnp.float32)   # BatchNorm1d bias init
        hidden_full.append((w, b, gamma, beta))
        hidden_params.append((w, gamma, beta))
        prev = h_dim

    key, k_mu, k_lv = jax.random.split(key, 3)
    w_mu, b_mu = linear_init(k_mu, prev, latent_dim)
    w_lv, b_lv = linear_init(k_lv, prev, latent_dim)
    head_params = (w_mu, b_mu, w_lv, b_lv)

    key, k_x, k_eps, k_drop = jax.random.split(key, 4)
    x = jax.random.normal(k_x, (batch, input_dim), jnp.float32)
    eps = jax.random.normal(k_eps, (batch, latent_dim), jnp.float32)

    # One-time parameter packing (hoisted out of the per-step forward).
    params_f32, meta = prepare_encoder_params(hidden_params, head_params, input_dim,
                                              matmul_dtype=jnp.float32)
    params_bf16, _ = prepare_encoder_params(hidden_params, head_params, input_dim,
                                            matmul_dtype=jnp.bfloat16)

    # 1) f32 matmuls, dropout disabled -> exact check against the reference
    #    (also verifies that dropping the BN-redundant linear biases is lossless).
    mu, logvar, z = encoder_forward(x, params_f32, meta, eps)
    jax.block_until_ready((mu, logvar, z))
    mu_r, logvar_r, z_r = _reference(x, hidden_full, head_params, eps)
    assert jnp.allclose(mu, mu_r, atol=1e-4, rtol=1e-4)
    assert jnp.allclose(logvar, logvar_r, atol=1e-4, rtol=1e-4)
    assert jnp.allclose(z, z_r, atol=1e-4, rtol=1e-4)

    # 2) bf16 matmul operands (f32 accumulation / f32 BN stats) -> loose check.
    mu_b, logvar_b, z_b = encoder_forward(x, params_bf16, meta, eps)
    jax.block_until_ready((mu_b, logvar_b, z_b))
    assert jnp.allclose(mu_b, mu_r, atol=1e-1, rtol=1e-1)
    assert jnp.allclose(logvar_b, logvar_r, atol=1e-1, rtol=1e-1)
    assert jnp.allclose(z_b, z_r, atol=1e-1, rtol=1e-1)

    # 3) Training-mode dropout (p=0.2) with a host-generated mask shared with the
    #    reference -> exact check of the dropout path as well.
    masks = make_dropout_masks(k_drop, meta, batch, drop_p=0.2)
    mu_d, logvar_d, z_d = encoder_forward(x, params_f32, meta, eps, dropout_masks=masks)
    jax.block_until_ready((mu_d, logvar_d, z_d))
    mu_dr, logvar_dr, z_dr = _reference(x, hidden_full, head_params, eps,
                                        dropout_masks=masks)
    assert jnp.allclose(mu_d, mu_dr, atol=1e-4, rtol=1e-4)
    assert jnp.allclose(logvar_d, logvar_dr, atol=1e-4, rtol=1e-4)
    assert jnp.allclose(z_d, z_dr, atol=1e-4, rtol=1e-4)
    assert bool(jnp.all(jnp.isfinite(z_d)))

    print("KERNEL_OK")
</pallas_src>

<mosaic_0001>
module attributes {stable_mosaic.version = 11 : i64} {
  func.func @_encoder_kernel(%arg0: memref<8x128xf32, #tpu.memory_space<vmem>>, %arg1: memref<2x128x128xf32, #tpu.memory_space<vmem>>, %arg2: memref<2x2x128xf32, #tpu.memory_space<vmem>>, %arg3: memref<128x256xf32, #tpu.memory_space<vmem>>, %arg4: memref<1x256xf32, #tpu.memory_space<vmem>>, %arg5: memref<8x128xf32, #tpu.memory_space<vmem>>, %arg6: memref<8x384xf32, #tpu.memory_space<vmem>>) attributes {dimension_semantics = [], scalar_prefetch = 0 : i64, scratch_operands = 0 : i64, tpu.core_type = #tpu.core_type<tc>} {
    %c0 = arith.constant 0 : index
    %c0_0 = arith.constant 0 : index
    %0 = vector.load %arg0[%c0, %c0_0] : memref<8x128xf32, #tpu.memory_space<vmem>>, vector<8x128xf32>
    %c0_1 = arith.constant 0 : index
    %c0_2 = arith.constant 0 : index
    %c0_3 = arith.constant 0 : index
    %1 = vector.load %arg1[%c0_1, %c0_2, %c0_3] : memref<2x128x128xf32, #tpu.memory_space<vmem>>, vector<1x128x128xf32>
    %2 = vector.shape_cast %1 : vector<1x128x128xf32> to vector<128x128xf32>
    %cst = arith.constant dense<0.000000e+00> : vector<8x128xf32>
    %3 = tpu.matmul %0, %2, %cst {dimension_numbers = #tpu.dot_dimension_numbers<[1], [0], [0], [1], [0, 0, 1, 1], [], []>} : vector<8x128xf32>, vector<128x128xf32>, vector<8x128xf32> -> vector<8x128xf32>
    %cst_4 = arith.constant dense<0.000000e+00> : vector<128xf32>
    %4 = vector.multi_reduction <add>, %3, %cst_4 [0] : vector<8x128xf32> to vector<128xf32>
    %5 = vector.shape_cast %4 : vector<128xf32> to vector<1x128xf32>
    %cst_5 = arith.constant 1.250000e-01 : f32
    %6 = vector.broadcast %cst_5 : f32 to vector<1x128xf32>
    %7 = arith.mulf %5, %6 : vector<1x128xf32>
    %8 = arith.mulf %3, %3 : vector<8x128xf32>
    %cst_6 = arith.constant dense<0.000000e+00> : vector<128xf32>
    %9 = vector.multi_reduction <add>, %8, %cst_6 [0] : vector<8x128xf32> to vector<128xf32>
    %10 = vector.shape_cast %9 : vector<128xf32> to vector<1x128xf32>
    %cst_7 = arith.constant 1.250000e-01 : f32
    %11 = vector.broadcast %cst_7 : f32 to vector<1x128xf32>
    %12 = arith.mulf %10, %11 : vector<1x128xf32>
    %13 = arith.mulf %7, %7 : vector<1x128xf32>
    %14 = arith.subf %12, %13 : vector<1x128xf32>
    %c0_8 = arith.constant 0 : index
    %c0_9 = arith.constant 0 : index
    %c0_10 = arith.constant 0 : index
    %15 = vector.load %arg2[%c0_8, %c0_9, %c0_10] : memref<2x2x128xf32, #tpu.memory_space<vmem>>, vector<1x2x128xf32>
    %16 = vector.shape_cast %15 : vector<1x2x128xf32> to vector<2x128xf32>
    %17 = vector.extract_strided_slice %16 {offsets = [0, 0], sizes = [1, 128], strides = [1, 1]} : vector<2x128xf32> to vector<1x128xf32>
    %cst_11 = arith.constant 9.99999974E-6 : f32
    %18 = vector.broadcast %cst_11 : f32 to vector<1x128xf32>
    %19 = arith.addf %14, %18 : vector<1x128xf32>
    %20 = math.rsqrt %19 : vector<1x128xf32>
    %21 = arith.mulf %17, %20 : vector<1x128xf32>
    %22 = vector.extract_strided_slice %16 {offsets = [1, 0], sizes = [1, 128], strides = [1, 1]} : vector<2x128xf32> to vector<1x128xf32>
    %23 = arith.mulf %7, %21 : vector<1x128xf32>
    %24 = arith.subf %22, %23 : vector<1x128xf32>
    %25 = vector.broadcast %21 : vector<1x128xf32> to vector<8x128xf32>
    %26 = arith.mulf %3, %25 : vector<8x128xf32>
    %27 = vector.broadcast %24 : vector<1x128xf32> to vector<8x128xf32>
    %28 = arith.addf %26, %27 : vector<8x128xf32>
    %cst_12 = arith.constant 0.000000e+00 : f32
    %29 = vector.broadcast %cst_12 : f32 to vector<8x128xf32>
    %30 = arith.cmpf ogt, %28, %29 : vector<8x128xf32>
    %cst_13 = arith.constant 2.000000e-01 : f32
    %31 = vector.broadcast %cst_13 : f32 to vector<8x128xf32>
    %32 = arith.mulf %31, %28 : vector<8x128xf32>
    %33 = arith.select %30, %28, %32 : vector<8x128xi1>, vector<8x128xf32>
    %c1 = arith.constant 1 : index
    %c0_14 = arith.constant 0 : index
    %c0_15 = arith.constant 0 : index
    %34 = vector.load %arg1[%c1, %c0_14, %c0_15] : memref<2x128x128xf32, #tpu.memory_space<vmem>>, vector<1x128x128xf32>
    %35 = vector.shape_cast %34 : vector<1x128x128xf32> to vector<128x128xf32>
    %cst_16 = arith.constant dense<0.000000e+00> : vector<8x128xf32>
    %36 = tpu.matmul %33, %35, %cst_16 {dimension_numbers = #tpu.dot_dimension_numbers<[1], [0], [0], [1], [0, 0, 1, 1], [], []>} : vector<8x128xf32>, vector<128x128xf32>, vector<8x128xf32> -> vector<8x128xf32>
    %cst_17 = arith.constant dense<0.000000e+00> : vector<128xf32>
    %37 = vector.multi_reduction <add>, %36, %cst_17 [0] : vector<8x128xf32> to vector<128xf32>
    %38 = vector.shape_cast %37 : vector<128xf32> to vector<1x128xf32>
    %cst_18 = arith.constant 1.250000e-01 : f32
    %39 = vector.broadcast %cst_18 : f32 to vector<1x128xf32>
    %40 = arith.mulf %38, %39 : vector<1x128xf32>
    %41 = arith.mulf %36, %36 : vector<8x128xf32>
    %cst_19 = arith.constant dense<0.000000e+00> : vector<128xf32>
    %42 = vector.multi_reduction <add>, %41, %cst_19 [0] : vector<8x128xf32> to vector<128xf32>
    %43 = vector.shape_cast %42 : vector<128xf32> to vector<1x128xf32>
    %cst_20 = arith.constant 1.250000e-01 : f32
    %44 = vector.broadcast %cst_20 : f32 to vector<1x128xf32>
    %45 = arith.mulf %43, %44 : vector<1x128xf32>
    %46 = arith.mulf %40, %40 : vector<1x128xf32>
    %47 = arith.subf %45, %46 : vector<1x128xf32>
    %c1_21 = arith.constant 1 : index
    %c0_22 = arith.constant 0 : index
    %c0_23 = arith.constant 0 : index
    %48 = vector.load %arg2[%c1_21, %c0_22, %c0_23] : memref<2x2x128xf32, #tpu.memory_space<vmem>>, vector<1x2x128xf32>
    %49 = vector.shape_cast %48 : vector<1x2x128xf32> to vector<2x128xf32>
    %50 = vector.extract_strided_slice %49 {offsets = [0, 0], sizes = [1, 128], strides = [1, 1]} : vector<2x128xf32> to vector<1x128xf32>
    %cst_24 = arith.constant 9.99999974E-6 : f32
    %51 = vector.broadcast %cst_24 : f32 to vector<1x128xf32>
    %52 = arith.addf %47, %51 : vector<1x128xf32>
    %53 = math.rsqrt %52 : vector<1x128xf32>
    %54 = arith.mulf %50, %53 : vector<1x128xf32>
    %55 = vector.extract_strided_slice %49 {offsets = [1, 0], sizes = [1, 128], strides = [1, 1]} : vector<2x128xf32> to vector<1x128xf32>
    %56 = arith.mulf %40, %54 : vector<1x128xf32>
    %57 = arith.subf %55, %56 : vector<1x128xf32>
    %58 = vector.broadcast %54 : vector<1x128xf32> to vector<8x128xf32>
    %59 = arith.mulf %36, %58 : vector<8x128xf32>
    %60 = vector.broadcast %57 : vector<1x128xf32> to vector<8x128xf32>
    %61 = arith.addf %59, %60 : vector<8x128xf32>
    %cst_25 = arith.constant 0.000000e+00 : f32
    %62 = vector.broadcast %cst_25 : f32 to vector<8x128xf32>
    %63 = arith.cmpf ogt, %61, %62 : vector<8x128xf32>
    %cst_26 = arith.constant 2.000000e-01 : f32
    %64 = vector.broadcast %cst_26 : f32 to vector<8x128xf32>
    %65 = arith.mulf %64, %61 : vector<8x128xf32>
    %66 = arith.select %63, %61, %65 : vector<8x128xi1>, vector<8x128xf32>
    %c0_27 = arith.constant 0 : index
    %c0_28 = arith.constant 0 : index
    %67 = vector.load %arg3[%c0_27, %c0_28] : memref<128x256xf32, #tpu.memory_space<vmem>>, vector<128x256xf32>
    %cst_29 = arith.constant dense<0.000000e+00> : vector<8x256xf32>
    %68 = tpu.matmul %66, %67, %cst_29 {dimension_numbers = #tpu.dot_dimension_numbers<[1], [0], [0], [1], [0, 0, 1, 1], [], []>} : vector<8x128xf32>, vector<128x256xf32>, vector<8x256xf32> -> vector<8x256xf32>
    %c0_30 = arith.constant 0 : index
    %c0_31 = arith.constant 0 : index
    %69 = vector.load %arg4[%c0_30, %c0_31] : memref<1x256xf32, #tpu.memory_space<vmem>>, vector<1x256xf32>
    %70 = vector.broadcast %69 : vector<1x256xf32> to vector<8x256xf32>
    %71 = arith.addf %68, %70 : vector<8x256xf32>
    %72 = vector.extract_strided_slice %71 {offsets = [0, 0], sizes = [8, 128], strides = [1, 1]} : vector<8x256xf32> to vector<8x128xf32>
    %73 = vector.extract_strided_slice %71 {offsets = [0, 128], sizes = [8, 128], strides = [1, 1]} : vector<8x256xf32> to vector<8x128xf32>
    %cst_32 = arith.constant 5.000000e-01 : f32
    %74 = vector.broadcast %cst_32 : f32 to vector<8x128xf32>
    %75 = arith.mulf %74, %73 : vector<8x128xf32>
    %76 = math.exp %75 : vector<8x128xf32>
    %c0_33 = arith.constant 0 : index
    %c0_34 = arith.constant 0 : index
    %77 = vector.load %arg5[%c0_33, %c0_34] : memref<8x128xf32, #tpu.memory_space<vmem>>, vector<8x128xf32>
    %78 = arith.mulf %76, %77 : vector<8x128xf32>
    %79 = arith.addf %72, %78 : vector<8x128xf32>
    %80 = tpu.concatenate %71, %79 in 1 : vector<8x256xf32>, vector<8x128xf32> -> vector<8x384xf32>
    %c0_35 = arith.constant 0 : index
    %c0_36 = arith.constant 0 : index
    %81 = vector.load %arg6[%c0_35, %c0_36] : memref<8x384xf32, #tpu.memory_space<vmem>>, vector<8x384xf32>
    tpu.vector_store %arg6[%c0_35, %c0_36], %80 {strides = array<i32>} : memref<8x384xf32, #tpu.memory_space<vmem>>, vector<8x384xf32>,
    return
  }
}

</mosaic_0001>

<bundles_post_ra>
// kernel: tpu_custom_call.1
= control target key start
LH: loop header
LB: loop body
LE: loop exit
PB: predicated region body
PF: predicated region fallthrough
CT: control target
= control target key end

     0   :  { %11 = vsyncpa [#allocation3], 0  ;;  %s884_s0 = inlined_call_operand.hbm [shape: f32[8,128], index: 0, kind: input, shape index: {}]   ;;  %s885_s1 = inlined_call_operand.hbm [shape: f32[2,128,128], index: 1, kind: input, shape index: {}]   ;;  %s886_s2 = inlined_call_operand.vmem [shape: f32[2,2,128], index: 2, kind: input, shape index: {}]   ;;  %s887_s3 = inlined_call_operand.hbm [shape: f32[128,256], index: 3, kind: input, shape index: {}]   ;;  %s888_s4 = inlined_call_operand.vmem [shape: f32[1,256], index: 4, kind: input, shape index: {}]   ;;  %s889_s5 = inlined_call_operand.vmem [shape: f32[8,128], index: 5, kind: input, shape index: {}]   ;;  %s890_s6 = inlined_call_operand.hbm [shape: f32[8,384], index: 6, kind: output, shape index: {}]  }
   0x1   :  { %12 = vsyncpa [#allocation6], 0 }
   0x2   :  { %13 = vsyncpa [#allocation4], 0  ;;  %s752_s21 = smov [#allocation5]   ;;  %s658_s25 = scalar_lea.hbm %s885_s1, 4096 }
   0x3   :  { %s29_s22 = sshll.u32 %s752_s21, 4  ;;  %p659_p0 = scmp.ne.s32.totalorder %s885_s1, %s658_s25  ;;  %s30_s22 = int_to_ptr.vmem [resolvable:$true] %s29_s22 }
   0x4   :  { %p662_p1 = scmp.lt.u32.totalorder %s658_s25, %s885_s1 }
   0x6   :  { %p664_p2 = pnand %p662_p1, %p659_p0 }
   0x8   :  { %667 = shalt.err (!%p664_p2)
}
   0x9   :  { %s668_s30 = scalar_lea.vmem %s30_s22, 4096  ;;  %p673_p4 = scmp.lt.s32.totalorder %s30_s22, %s30_s22 }
   0xa   :  { %p669_p3 = scmp.ne.s32.totalorder %s30_s22, %s668_s30  ;;  %p674_p5 = scmp.lt.s32.totalorder %s668_s30, %s668_s30 }
   0xc   :  { %p675_p6 = por %p674_p5, %p673_p4 }
   0xe   :  { %p676_p7 = pnand %p675_p6, %p669_p3 }
  0x10   :  { %679 = shalt.err (!%p676_p7)
}
  0x11   :  { %s753_s7 = smov 128   ;;  %s754_s8 = smov 8  }
  0x12   :  { %35 = dma.hbm_to_vmem [thread:$0]  %s885_s1, 4096, %s30_s22, [#allocation6], %s753_s7, %s753_s7, %s754_s8  }
  0x13   :  { %s755_s11 = smov [#allocation2]   ;;  %s756_s13 = smov [#allocation7]  }
  0x14   :  { %s20_s12 = sshll.u32 %s755_s11, 4  ;;  %s43_s14 = sshll.u32 %s756_s13, 4  ;;  %s21_s12 = int_to_ptr.vmem [resolvable:$true] %s20_s12  ;;  %s44_s14 = int_to_ptr.vmem [resolvable:$true] %s43_s14 }
  0x15   :  { %s680_s17 = scalar_lea.hbm %s884_s0, 128 }
  0x16   :  { %p681_p8 = scmp.ne.s32.totalorder %s884_s0, %s680_s17  ;;  %p684_p9 = scmp.lt.u32.totalorder %s680_s17, %s884_s0 }
  0x18   :  { %p686_p10 = pnand %p684_p9, %p681_p8 }
  0x1a   :  { %689 = shalt.err (!%p686_p10)
}
  0x1b   :  { %s690_s1 = scalar_lea.vmem %s21_s12, 128  ;;  %p695_p12 = scmp.lt.s32.totalorder %s21_s12, %s21_s12 }
  0x1c   :  { %p691_p11 = scmp.ne.s32.totalorder %s21_s12, %s690_s1  ;;  %p696_p13 = scmp.lt.s32.totalorder %s690_s1, %s690_s1 }
  0x1e   :  { %p697_p0 = por %p696_p13, %p695_p12 }
  0x20   :  { %p698_p1 = pnand %p697_p0, %p691_p11 }
  0x22   :  { %701 = shalt.err (!%p698_p1)
}
  0x23   :  { %23 = dma.hbm_to_vmem [thread:$0]  %s884_s0, 128, %s21_s12, [#allocation3]  }
  0x24   :  { %s702_s26 = scalar_lea.hbm %s887_s3, 4096 }
  0x25   :  { %p703_p2 = scmp.ne.s32.totalorder %s887_s3, %s702_s26  ;;  %p706_p3 = scmp.lt.u32.totalorder %s702_s26, %s887_s3 }
  0x27   :  { %p708_p4 = pnand %p706_p3, %p703_p2 }
  0x29   :  { %711 = shalt.err (!%p708_p4)
}
  0x2a   :  { %s712_s7 = scalar_lea.vmem %s44_s14, 4096  ;;  %p717_p6 = scmp.lt.s32.totalorder %s44_s14, %s44_s14 }
  0x2b   :  { %p713_p5 = scmp.ne.s32.totalorder %s44_s14, %s712_s7  ;;  %p718_p7 = scmp.lt.s32.totalorder %s712_s7, %s712_s7 }
  0x2d   :  { %p719_p8 = por %p718_p7, %p717_p6 }
  0x2f   :  { %p720_p9 = pnand %p719_p8, %p713_p5 }
  0x31   :  { %723 = shalt.err (!%p720_p9)
}
  0x32   :  { %s757_s0 = smov 256   ;;  %s758_s8 = smov 16  }
  0x33   :  { %49 = dma.hbm_to_vmem [thread:$0]  %s887_s3, 4096, %s44_s14, [#allocation6], %s757_s0, %s757_s0, %s758_s8  }
  0x34   :  { %746 = dma.done.wait [#allocation3], 128  }
  0x35   :  { %747 = vsyncadd [#allocation3], 4294967168 }
  0x36   :  { %748 = dma.done.wait [#allocation6], 8192  }
  0x37   :  { %749 = vsyncadd [#allocation6], 4294959104  ;;  %v759_v0 = vmov 0.0|0.0   ;;  %vm760_vm0 = vmmov 0   ;;  %v761_v1 = vmov 0.0   ;;  %v64_v2 = vld [vmem:[#allocation5] sm:$0xff] }
  0x38   :  { %561 = vmatprep.subr.bf16.mxu0 %v759_v0  ;;  %523 = vmatprep.mubr.msk.f32.mxu0 %vm760_vm0, %v761_v1  ;;  %v65_v3 = vld [vmem:[#allocation5 + $0x8] sm:$0xff]  ;;  %v66_v4 = vld [vmem:[#allocation5 + $0x10] sm:$0xff]  ;;  %v67_v6 = vld [vmem:[#allocation5 + $0x18] sm:$0xff]  ;;  %s762_s17 = smov [#allocation8]  }
  0x39   :  { %585 = vmatprep.subr.bf16.mxu1 %v759_v0  ;;  %558 = vmatprep.mubr.msk.f32.mxu1 %vm760_vm0, %v761_v1  ;;  %v562_v5 = vpack.c.bf16 %v65_v3, %v64_v2  ;;  %v565_v7 = vpack.c.bf16 %v67_v6, %v66_v4  ;;  %v68_v8 = vld [vmem:[#allocation5 + $0x20] sm:$0xff]  ;;  %v69_v9 = vld [vmem:[#allocation5 + $0x28] sm:$0xff]  ;;  %v70_v11 = vld [vmem:[#allocation5 + $0x30] sm:$0xff] }
  0x3a   :  { %v568_v10 = vpack.c.bf16 %v69_v9, %v68_v8  ;;  %v71_v12 = vld [vmem:[#allocation5 + $0x38] sm:$0xff]  ;;  %v72_v14 = vld [vmem:[#allocation5 + $0x40] sm:$0xff]  ;;  %v73_v15 = vld [vmem:[#allocation5 + $0x48] sm:$0xff] }
  0x3b   :  { %563 = vmatpush3.bf16.msra.mxu0 %v562_v5  ;;  %v571_v13 = vpack.c.bf16 %v71_v12, %v70_v11  ;;  %v574_v16 = vpack.c.bf16 %v73_v15, %v72_v14  ;;  %v74_v17 = vld [vmem:[#allocation5 + $0x50] sm:$0xff]  ;;  %v75_v18 = vld [vmem:[#allocation5 + $0x58] sm:$0xff]  ;;  %v76_v20 = vld [vmem:[#allocation5 + $0x60] sm:$0xff] }
  0x3c   :  { %564 = vmatprep.subr.bf16.mxu0 %v759_v0  ;;  %v577_v19 = vpack.c.bf16 %v75_v18, %v74_v17  ;;  %v77_v21 = vld [vmem:[#allocation5 + $0x68] sm:$0xff]  ;;  %v78_v23 = vld [vmem:[#allocation5 + $0x70] sm:$0xff]  ;;  %v79_v24 = vld [vmem:[#allocation5 + $0x78] sm:$0xff] }
  0x3d   :  { %v580_v22 = vpack.c.bf16 %v77_v21, %v76_v20  ;;  %v583_v25 = vpack.c.bf16 %v79_v24, %v78_v23  ;;  %v63_v26 = vld [vmem:[#allocation2] sm:$0xff]  ;;  %v190_v27 = vld [vmem:[#allocation5 + $0x80] sm:$0xff]  ;;  %v191_v28 = vld [vmem:[#allocation5 + $0x88] sm:$0xff] }
  0x3e   :  { %v586_v29 = vpack.c.bf16 %v191_v28, %v190_v27  ;;  %v192_v30 = vld [vmem:[#allocation5 + $0x90] sm:$0xff]  ;;  %v193_v31 = vld [vmem:[#allocation5 + $0x98] sm:$0xff]  ;;  %v194_v33 = vld [vmem:[#allocation5 + $0xa0] sm:$0xff] }
  0x3f   :  { %566 = vmatpush3.bf16.msra.mxu0 %v565_v7  ;;  %v589_v32 = vpack.c.bf16 %v193_v31, %v192_v30  ;;  %v195_v34 = vld [vmem:[#allocation5 + $0xa8] sm:$0xff]  ;;  %v196_v36 = vld [vmem:[#allocation5 + $0xb0] sm:$0xff]  ;;  %v197_v37 = vld [vmem:[#allocation5 + $0xb8] sm:$0xff]  ;;  %v176_v7 = vlaneseq }
  0x40   :  { %567 = vmatprep.subr.bf16.mxu0 %v759_v0  ;;  %587 = vmatpush3.bf16.msra.mxu1 %v586_v29  ;;  %v592_v35 = vpack.c.bf16 %v195_v34, %v194_v33  ;;  %v595_v38 = vpack.c.bf16 %v197_v37, %v196_v36  ;;  %v198_v39 = vld [vmem:[#allocation5 + $0xc0] sm:$0xff]  ;;  %v199_v40 = vld [vmem:[#allocation5 + $0xc8] sm:$0xff]  ;;  %v200_v42 = vld [vmem:[#allocation5 + $0xd0] sm:$0xff] }
  0x41   :  { %588 = vmatprep.subr.bf16.mxu1 %v759_v0  ;;  %v598_v41 = vpack.c.bf16 %v199_v40, %v198_v39  ;;  %v201_v43 = vld [vmem:[#allocation5 + $0xd8] sm:$0xff]  ;;  %v202_v45 = vld [vmem:[#allocation5 + $0xe0] sm:$0xff]  ;;  %v203_v46 = vld [vmem:[#allocation5 + $0xe8] sm:$0xff]  ;;  %v177_v8 = vshrl.u32 %v176_v7, 7 }
  0x42   :  { %v601_v44 = vpack.c.bf16 %v201_v43, %v200_v42  ;;  %v604_v47 = vpack.c.bf16 %v203_v46, %v202_v45  ;;  %v204_v48 = vld [vmem:[#allocation5 + $0xf0] sm:$0xff]  ;;  %v205_v49 = vld [vmem:[#allocation5 + $0xf8] sm:$0xff]  ;;  %v317_v23 = vld [vmem:[#allocation7 + $0x8] sm:$0xff] }
  0x43   :  { %569 = vmatpush3.bf16.msra.mxu0 %v568_v10  ;;  %v607_v50 = vpack.c.bf16 %v205_v49, %v204_v48  ;;  %v167_v9 = vld [vmem:[%s886_s2] sm:$0x3]  ;;  %v853_v12 = vsub.s32 0, %v177_v8  ;;  %v318_v27 = vld [vmem:[#allocation7 + $0x10] sm:$0xff]  ;;  %v321_v29 = vld [vmem:[#allocation7 + $0x28] sm:$0xff] }
  0x44   :  { %570 = vmatprep.subr.bf16.mxu0 %v759_v0  ;;  %590 = vmatpush3.bf16.msra.mxu1 %v589_v32  ;;  %v319_v24 = vld [vmem:[#allocation7 + $0x18] sm:$0xff]  ;;  %v320_v32 = vld [vmem:[#allocation7 + $0x20] sm:$0xff]  ;;  %v322_v33 = vld [vmem:[#allocation7 + $0x30] sm:$0xff] }
  0x45   :  { %591 = vmatprep.subr.bf16.mxu1 %v759_v0  ;;  %v323_v30 = vld [vmem:[#allocation7 + $0x38] sm:$0xff]  ;;  %v615_v34 = vpack.c.bf16 %v322_v33, %v320_v32  ;;  %v326_v39 = vld [vmem:[#allocation7 + $0x50] sm:$0xff] }
  0x46   :  { %v613_v31 = vpack.c.bf16 %v323_v30, %v321_v29  ;;  %v327_v36 = vld [vmem:[#allocation7 + $0x58] sm:$0xff]  ;;  %v330_v45 = vld [vmem:[#allocation7 + $0x70] sm:$0xff] }
  0x47   :  { %572 = vmatpush3.bf16.msra.mxu0 %v571_v13  ;;  %v331_v42 = vld [vmem:[#allocation7 + $0x78] sm:$0xff] }
  0x48   :  { %573 = vmatprep.subr.bf16.mxu0 %v759_v0  ;;  %593 = vmatpush3.bf16.msra.mxu1 %v592_v35  ;;  %v325_v35 = vld [vmem:[#allocation7 + $0x48] sm:$0xff]  ;;  %v335_v48 = vld [vmem:[#allocation7 + $0x98] sm:$0xff] }
  0x49   :  { %594 = vmatprep.subr.bf16.mxu1 %v759_v0  ;;  %v617_v37 = vpack.c.bf16 %v327_v36, %v325_v35  ;;  %v456_v29 = vld [vmem:[%s886_s2 + $0x2] sm:$0x3] }
  0x4b   :  { %575 = vmatpush3.bf16.msra.mxu0 %v574_v16  ;;  %v856_v16 = vsub.s32 1, %v177_v8 }
  0x4c   :  { %576 = vmatprep.subr.bf16.mxu0 %v759_v0  ;;  %596 = vmatpush3.bf16.msra.mxu1 %v595_v38  ;;  %v324_v38 = vld [vmem:[#allocation7 + $0x40] sm:$0xff] }
  0x4d   :  { %597 = vmatprep.subr.bf16.mxu1 %v759_v0  ;;  %v619_v40 = vpack.c.bf16 %v326_v39, %v324_v38 }
  0x4f   :  { %578 = vmatpush3.bf16.msra.mxu0 %v577_v19 }
  0x50   :  { %579 = vmatprep.subr.bf16.mxu0 %v759_v0  ;;  %599 = vmatpush3.bf16.msra.mxu1 %v598_v41  ;;  %v329_v41 = vld [vmem:[#allocation7 + $0x68] sm:$0xff] }
  0x51   :  { %600 = vmatprep.subr.bf16.mxu1 %v759_v0  ;;  %v621_v43 = vpack.c.bf16 %v331_v42, %v329_v41  ;;  %v348_v41 = vld [vmem:[%s888_s4] sm:$0x3]  ;;  %s446_s4 = sshll.u32 %s762_s17, 4  ;;  %s447_s4 = int_to_ptr.vmem [resolvable:$true] %s446_s4 }
  0x52   :  { %v353_v42 = vrot.slane %v348_v41, %v853_v12  ;;  %s724_s18 = scalar_lea.vmem %s447_s4, 384  ;;  %p729_p11 = scmp.lt.s32.totalorder %s447_s4, %s447_s4 }
  0x53   :  { %581 = vmatpush3.bf16.msra.mxu0 %v580_v22  ;;  %p725_p10 = scmp.ne.s32.totalorder %s447_s4, %s724_s18  ;;  %p730_p12 = scmp.lt.s32.totalorder %s724_s18, %s724_s18 }
  0x54   :  { %582 = vmatprep.subr.bf16.mxu0 %v759_v0  ;;  %602 = vmatpush3.bf16.msra.mxu1 %v601_v44  ;;  %v328_v44 = vld [vmem:[#allocation7 + $0x60] sm:$0xff] }
  0x55   :  { %603 = vmatprep.subr.bf16.mxu1 %v759_v0  ;;  %v623_v46 = vpack.c.bf16 %v330_v45, %v328_v44  ;;  %p731_p13 = por %p730_p12, %p729_p11 }
  0x57   :  { %584 = vmatpush3.bf16.msra.mxu0 %v583_v25  ;;  %v609_v25 = vpack.c.bf16 %v319_v24, %v317_v23  ;;  %p732_p0 = pnand %p731_p13, %p725_p10 }
  0x58   :  { %605 = vmatpush3.bf16.msra.mxu1 %v604_v47  ;;  %v333_v47 = vld [vmem:[#allocation7 + $0x88] sm:$0xff] }
  0x59   :  { %606 = vmatprep.subr.bf16.mxu1 %v759_v0  ;;  %610 = vmatprep.subr.bf16.mxu0 %v609_v25  ;;  %v625_v49 = vpack.c.bf16 %v335_v48, %v333_v47 }
  0x5a   :  { %524 = vmatmul.mubr.f32.vlgmr.msra.gmra.mrb[0].mxu0 %v63_v26  ;;  %v316_v26 = vld [vmem:[#allocation7] sm:$0xff] }
  0x5b   :  { %424 = vmatprep.mubr.f32.mxu0 %v761_v1  ;;  %v611_v28 = vpack.c.bf16 %v318_v27, %v316_v26 }
  0x5c   :  { %608 = vmatpush3.bf16.msra.mxu1 %v607_v50  ;;  %v332_v50 = vld [vmem:[#allocation7 + $0x80] sm:$0xff] }
  0x5d   :  { %612 = vmatpush1.bf16.msra.mxu0 %v611_v28 }
  0x5e   :  { %614 = vmatprep.subr.bf16.mxu0 %v613_v31 }
  0x61   :  { %616 = vmatpush1.bf16.msra.mxu0 %v615_v34 }
  0x62   :  { %618 = vmatprep.subr.bf16.mxu0 %v617_v37 }
  0x65   :  { %620 = vmatpush1.bf16.msra.mxu0 %v619_v40 }
  0x66   :  { %622 = vmatprep.subr.bf16.mxu0 %v621_v43  ;;  %v357_v43 = vrot.slane %v348_v41, %v856_v16 }
  0x69   :  { %624 = vmatpush1.bf16.msra.mxu0 %v623_v46 }
  0x6a   :  { %626 = vmatprep.subr.bf16.mxu0 %v625_v49 }
 0x12d   :  { %v146_v51 = vpop.f32.mrb[0].mxu0 }
 0x12e   :  { %v150_v52 = vrot.slane %v146_v51, 4  ;;  %v157_v53 = vmul.f32 %v146_v51, %v146_v51  ;;  %v525_v54 = vpop.f32.mrb[1].mxu0 }
 0x12f   :  { %v339_v54 = vld [vmem:[#allocation7 + $0xb8] sm:$0xff] }
 0x130   :  { %v151_v55 = vadd.f32 %v150_v52, %v146_v51  ;;  %v158_v56 = vrot.slane %v157_v53, 4 }
 0x132   :  { %v152_v57 = vrot.slane %v151_v55, 2  ;;  %v159_v58 = vadd.f32 %v158_v56, %v157_v53  ;;  %v337_v53 = vld [vmem:[#allocation7 + $0xa8] sm:$0xff]  ;;  %v336_v56 = vld [vmem:[#allocation7 + $0xa0] sm:$0xff] }
 0x134   :  { %v153_v59 = vadd.f32 %v152_v57, %v151_v55  ;;  %v160_v60 = vrot.slane %v159_v58, 2  ;;  %v629_v55 = vpack.c.bf16 %v339_v54, %v337_v53  ;;  %v338_v57 = vld [vmem:[#allocation7 + $0xb0] sm:$0xff] }
 0x136   :  { %v154_v61 = vrot.slane %v153_v59, 1  ;;  %v161_v62 = vadd.f32 %v160_v60, %v159_v58  ;;  %v631_v58 = vpack.c.bf16 %v338_v57, %v336_v56  ;;  %v343_v60 = vld [vmem:[#allocation7 + $0xd8] sm:$0xff] }
 0x138   :  { %v155_v63 = vadd.f32 %v154_v61, %v153_v59  ;;  %v162_v1 = vrot.slane %v161_v62, 1  ;;  %v341_v59 = vld [vmem:[#allocation7 + $0xc8] sm:$0xff] }
 0x139   :  { %v633_v61 = vpack.c.bf16 %v343_v60, %v341_v59 }
 0x13a   :  { %v156_v2 = vmul.f32 0.125, %v155_v63  ;;  %v163_v3 = vadd.f32 %v162_v1, %v161_v62  ;;  %v340_v62 = vld [vmem:[#allocation7 + $0xc0] sm:$0xff]  ;;  %v342_v63 = vld [vmem:[#allocation7 + $0xd0] sm:$0xff] }
 0x13b   :  { %v635_v1 = vpack.c.bf16 %v342_v63, %v340_v62 }
 0x13c   :  { %v164_v4 = vmul.f32 0.125, %v163_v3  ;;  %v165_v5 = vmul.f32 %v156_v2, %v156_v2  ;;  %v347_v3 = vld [vmem:[#allocation7 + $0xf8] sm:$0xff] }
 0x13e   :  { %v166_v0 = vsub.f32 %v164_v4, %v165_v5  ;;  %v344_v5 = vld [vmem:[#allocation7 + $0xe0] sm:$0xff] }
 0x140   :  { %v168_v6 = vadd.f32 1e-05, %v166_v0  ;;  %v346_v0 = vld [vmem:[#allocation7 + $0xf0] sm:$0xff] }
 0x142   :  { %652 = vrsqrt.f32 %v168_v6  ;;  %v639_v6 = vpack.c.bf16 %v346_v0, %v344_v5 }
 0x14c   :  { %v653_v10 = vpop.eup %652 }
 0x14d   :  { %v170_v11 = vmul.f32 %v653_v10, %v167_v9 }
 0x14f   :  { %v171_v13 = vmul.f32 %v170_v11, %v156_v2  ;;  %v179_v14 = vrot.slane %v170_v11, %v853_v12  ;;  %v345_v2 = vld [vmem:[#allocation7 + $0xe8] sm:$0xff] }
 0x150   :  { %v637_v4 = vpack.c.bf16 %v347_v3, %v345_v2 }
 0x151   :  { %v173_v15 = vrot.slane %v171_v13, 7  ;;  %v180_v18 = vmul.f32 %v179_v14, %v146_v51  ;;  %v334_v51 = vld [vmem:[#allocation7 + $0x90] sm:$0xff] }
 0x152   :  { %v627_v52 = vpack.c.bf16 %v334_v51, %v332_v50  ;;  %v434_v50 = vld [vmem:[%s889_s5] sm:$0xff] }
 0x153   :  { %v175_v17 = vsub.f32 %v167_v9, %v173_v15 }
 0x154   :  { %628 = vmatpush1.bf16.msra.mxu0 %v627_v52 }
 0x155   :  { %v184_v19 = vrot.slane %v175_v17, %v856_v16  ;;  %630 = vmatprep.subr.bf16.mxu0 %v629_v55 }
 0x157   :  { %v185_v20 = vadd.f32 %v184_v19, %v180_v18 }
 0x158   :  { %632 = vmatpush1.bf16.msra.mxu0 %v631_v58 }
 0x159   :  { %vm186_vm1 = vcmp.gt.f32.partialorder %v185_v20, 0.0  ;;  %v187_v21 = vmul.f32 0.2, %v185_v20  ;;  %634 = vmatprep.subr.bf16.mxu0 %v633_v61 }
 0x15b   :  { %v188_v22 = vsel %vm186_vm1, %v185_v20, %v187_v21 }
 0x15c   :  { %559 = vmatmul.mubr.f32.vlgmr.msra.gmra.mrb[0].mxu1 %v188_v22  ;;  %636 = vmatpush1.bf16.msra.mxu0 %v635_v1 }
 0x15d   :  { %638 = vmatprep.subr.bf16.mxu0 %v637_v4 }
 0x160   :  { %640 = vmatpush1.bf16.msra.mxu0 %v639_v6 }
 0x22f   :  { %v272_v7 = vpop.f32.mrb[0].mxu1 }
 0x230   :  { %v276_v8 = vrot.slane %v272_v7, 4  ;;  %v283_v9 = vmul.f32 %v272_v7, %v272_v7  ;;  %v560_v10 = vpop.f32.mrb[1].mxu1 }
 0x232   :  { %v277_v11 = vadd.f32 %v276_v8, %v272_v7  ;;  %v284_v13 = vrot.slane %v283_v9, 4 }
 0x234   :  { %v278_v14 = vrot.slane %v277_v11, 2  ;;  %v285_v15 = vadd.f32 %v284_v13, %v283_v9 }
 0x236   :  { %v279_v17 = vadd.f32 %v278_v14, %v277_v11  ;;  %v286_v18 = vrot.slane %v285_v15, 2 }
 0x238   :  { %v280_v19 = vrot.slane %v279_v17, 1  ;;  %v287_v20 = vadd.f32 %v286_v18, %v285_v15 }
 0x23a   :  { %v281_v21 = vadd.f32 %v280_v19, %v279_v17  ;;  %v288_v22 = vrot.slane %v287_v20, 1 }
 0x23c   :  { %v282_v23 = vmul.f32 0.125, %v281_v21  ;;  %v289_v24 = vadd.f32 %v288_v22, %v287_v20 }
 0x23e   :  { %v290_v25 = vmul.f32 0.125, %v289_v24  ;;  %v291_v26 = vmul.f32 %v282_v23, %v282_v23 }
 0x240   :  { %v292_v27 = vsub.f32 %v290_v25, %v291_v26 }
 0x242   :  { %v295_v28 = vadd.f32 1e-05, %v292_v27 }
 0x244   :  { %654 = vrsqrt.f32 %v295_v28 }
 0x24e   :  { %v655_v30 = vpop.eup %654 }
 0x24f   :  { %v297_v31 = vmul.f32 %v655_v30, %v456_v29 }
 0x251   :  { %v298_v32 = vmul.f32 %v297_v31, %v282_v23  ;;  %v306_v34 = vrot.slane %v297_v31, %v853_v12 }
 0x253   :  { %v300_v33 = vrot.slane %v298_v32, 7  ;;  %v307_v36 = vmul.f32 %v306_v34, %v272_v7 }
 0x255   :  { %v302_v35 = vsub.f32 %v456_v29, %v300_v33 }
 0x257   :  { %v311_v37 = vrot.slane %v302_v35, %v856_v16 }
 0x259   :  { %v312_v38 = vadd.f32 %v311_v37, %v307_v36 }
 0x25b   :  { %vm313_vm2 = vcmp.gt.f32.partialorder %v312_v38, 0.0  ;;  %v314_v39 = vmul.f32 0.2, %v312_v38 }
 0x25d   :  { %v315_v40 = vsel %vm313_vm2, %v312_v38, %v314_v39 }
 0x25e   :  { %425 = vmatmul.mubr.f32.vlgmr.msra.gmra.mrb[2].mxu0 %v315_v40 }
 0x331   :  { %v426_v44 = vpop.f32.mrb[2].mxu0 }
 0x332   :  { %v427_v45 = vadd.f32 %v426_v44, %v353_v42  ;;  %v428_v46 = vpop.f32.mrb[3].mxu0 }
 0x333   :  { %v429_v47 = vadd.f32 %v428_v46, %v357_v43 }
 0x334   :  { %437 = vst [vmem:[#allocation8] sm:$0xff] %v427_v45 }
 0x335   :  { %v431_v48 = vmul.f32 0.5, %v429_v47  ;;  %438 = vst [vmem:[#allocation8 + $0x8] sm:$0xff] %v429_v47 }
 0x337   :  { %v432_v49 = vmul.f32 1.442695, %v431_v48 }
 0x339   :  { %656 = vpow2.f32 %v432_v49 }
 0x343   :  { %v657_v51 = vpop.eup %656 }
 0x344   :  { %v435_v52 = vmul.f32 %v657_v51, %v434_v50 }
 0x346   :  { %v436_v12 = vadd.f32 %v435_v52, %v427_v45 }
 0x348   :  { %439 = vst [vmem:[#allocation8 + $0x10] sm:$0xff] %v436_v12 }
 0x349   :  { %735 = shalt.err (!%p732_p0)
}
 0x34a   :  { %s736_s21 = scalar_lea.hbm %s890_s6, 384 }
 0x34b   :  { %p737_p1 = scmp.ne.s32.totalorder %s890_s6, %s736_s21  ;;  %p740_p2 = scmp.lt.u32.totalorder %s736_s21, %s890_s6 }
 0x34d   :  { %p742_p3 = pnand %p740_p2, %p737_p1 }
 0x34f   :  { %745 = shalt.err (!%p742_p3)
}
 0x350   :  { %449 = dma.vmem_to_hbm [thread:$0]  %s447_s4, 384, %s890_s6, [#allocation4]  }
 0x351   :  { %750 = dma.done.wait [#allocation4], 384  }
 0x352   :  { %751 = vsyncadd [#allocation4], 4294966912 }
 0x353   :  { %453 = vsyncpa [#allocation3], 1 }
 0x354   :  { %454 = vsyncpa [#allocation6], 1 }
 0x355   :  { %455 = vsyncpa [#allocation4], 1 }

</bundles_post_ra>
